<compile_context>
chip_gen: v7x
topology: tpu7x:2x2x1
jax: 0.10.0
libtpu: 0.0.40
codegen_flags: <defaults>
</compile_context>

<pallas_src>
import jax
import jax.numpy as jnp
from jax.experimental import pallas as pl
from jax.experimental.pallas import tpu as pltpu

NEG_SLOPE = 0.01  # nn.LeakyReLU() default negative_slope


def _round_up(x, m):
    return ((x + m - 1) // m) * m


def _conv_mm_lrelu_kernel(x_ref, w_ref, b_ref, o_ref, acc_ref):
    # x_ref: (TM, TK) bf16   w_ref: (TK, TN) bf16   b_ref: (1, TN) f32
    # o_ref: (TM, TN) f32    acc_ref: (TM, TN) f32 VMEM scratch (resident over K)
    @pl.when(pl.program_id(2) == 0)
    def _init():
        acc_ref[...] = jnp.zeros_like(acc_ref)

    acc_ref[...] += jnp.dot(x_ref[...], w_ref[...],
                            preferred_element_type=jnp.float32)

    @pl.when(pl.program_id(2) == pl.num_programs(2) - 1)
    def _finalize():
        acc = acc_ref[...] + b_ref[...]                 # bias broadcast (f32)
        o_ref[...] = jnp.where(acc >= 0, acc, NEG_SLOPE * acc).astype(o_ref.dtype)


def conv_lrelu_pallas(x_nhwc, w, b, *, k=5, s=2, p=2):
    """Conv2d(k, stride=s, padding=p) + LeakyReLU(0.01) via a tiled Pallas matmul.

    x_nhwc: (N, H, W, Cin) float32
    w:      PyTorch layout (Cout, Cin, k, k)
    b:      (Cout,)
    returns (N, Ho, Wo, Cout) float32
    """
    N, H, W, C = x_nhwc.shape
    Cout = w.shape[0]
    Ho = (H + 2 * p - k) // s + 1
    Wo = (W + 2 * p - k) // s + 1

    # ---- XLA glue: zero-pad + im2col patch extraction (channel-last taps) ----
    # TODO(synk): fold the k*k taps into the in-kernel K reduction via strided
    # HBM DMA so the k*k-expanded `cols` tensor is never materialized in HBM.
    xp = jnp.pad(x_nhwc, ((0, 0), (p, p), (p, p), (0, 0)))
    patches = []
    for kh in range(k):
        for kw in range(k):
            patches.append(
                jax.lax.slice(
                    xp,
                    (0, kh, kw, 0),
                    (N, kh + s * (Ho - 1) + 1, kw + s * (Wo - 1) + 1, C),
                    (1, s, s, 1),
                )
            )
    cols = jnp.concatenate(patches, axis=-1)             # (N, Ho, Wo, k*k*C)

    M = N * Ho * Wo
    K = k * k * C

    # ---- tile sizes: lane-dense Cout, MXU/VMEM-friendly on v5e/v6e/v7x ----
    TN = 128
    Cout_p = _round_up(Cout, TN)
    K128 = _round_up(K, 128)
    TK = K128 if K128 <= 512 else 512
    K_p = _round_up(K, TK)
    TM = 512 if M >= 512 else _round_up(M, 16)
    M_p = _round_up(M, TM)

    # bf16 MXU operands (f32 accumulation in-kernel); zero-pad to tile multiples.
    x2d = cols.reshape(M, K).astype(jnp.bfloat16)
    x2d = jnp.pad(x2d, ((0, M_p - M), (0, K_p - K)))
    # weight matrix matching patch ordering: [(kh*k+kw)*C + c, co] = w[co, c, kh, kw]
    w2d = jnp.transpose(w, (2, 3, 1, 0)).reshape(K, Cout).astype(jnp.bfloat16)
    w2d = jnp.pad(w2d, ((0, K_p - K), (0, Cout_p - Cout)))
    b2d = jnp.pad(b.astype(jnp.float32).reshape(1, Cout),
                  ((0, 0), (0, Cout_p - Cout)))

    grid = (M_p // TM, Cout_p // TN, K_p // TK)
    cost = pl.CostEstimate(
        flops=2 * M_p * K_p * Cout_p,
        transcendentals=0,
        bytes_accessed=M_p * K_p * 2 + K_p * Cout_p * 2 + M_p * Cout_p * 4,
    )

    out = pl.pallas_call(
        _conv_mm_lrelu_kernel,
        out_shape=jax.ShapeDtypeStruct((M_p, Cout_p), jnp.float32),
        grid_spec=pltpu.PrefetchScalarGridSpec(
            num_scalar_prefetch=0,
            grid=grid,
            in_specs=[
                pl.BlockSpec((TM, TK), lambda i, j, kk: (i, kk)),
                pl.BlockSpec((TK, TN), lambda i, j, kk: (kk, j)),
                pl.BlockSpec((1, TN), lambda i, j, kk: (0, j)),
            ],
            out_specs=pl.BlockSpec((TM, TN), lambda i, j, kk: (i, j)),
            scratch_shapes=[pltpu.VMEM((TM, TN), jnp.float32)],
        ),
        compiler_params=pltpu.CompilerParams(
            dimension_semantics=("parallel", "parallel", "arbitrary")),
        cost_estimate=cost,
    )(x2d, w2d, b2d)

    return out[:M, :Cout].reshape(N, Ho, Wo, Cout)


def init_params(key, in_ch, out_ch, is_local=True):
    """Deterministic synthetic init of the 4 conv layers (PyTorch weight layout)."""
    chans = [in_ch, out_ch, out_ch * 2, out_ch * 4,
             out_ch * 8 if is_local else out_ch * 4]
    params = []
    for li in range(4):
        cin, cout = chans[li], chans[li + 1]
        key, kw_, kb_ = jax.random.split(key, 3)
        fan_in = cin * 5 * 5
        w = jax.random.normal(kw_, (cout, cin, 5, 5), jnp.float32) * (1.0 / fan_in) ** 0.5
        b = jax.random.normal(kb_, (cout,), jnp.float32) * 0.01
        params.append((w, b))
    return params


def flatten_module_forward(x_nchw, params):
    x = jnp.transpose(x_nchw, (0, 2, 3, 1))              # NCHW -> NHWC
    for (w, b) in params:
        x = conv_lrelu_pallas(x, w, b, k=5, s=2, p=2)
    x = jnp.transpose(x, (0, 3, 1, 2))                   # NHWC -> NCHW (match torch .view)
    return x.reshape(x.shape[0], -1)                     # x.view(N, -1)


if __name__ == "__main__":
    key = jax.random.PRNGKey(0)
    k_x, k_p = jax.random.split(key)

    # small shapes: batch=2, in_ch=4, out_ch=4, spatial=16  (16 -> 8 -> 4 -> 2 -> 1)
    N, IN_CH, OUT_CH, S = 2, 4, 4, 16
    x = jax.random.normal(k_x, (N, IN_CH, S, S), jnp.float32)
    params = init_params(k_p, IN_CH, OUT_CH, is_local=True)

    y = flatten_module_forward(x, params)
    jax.block_until_ready(y)
    assert y.shape == (N, OUT_CH * 8 * 1 * 1), y.shape    # (2, 32)
    print("KERNEL_OK")
</pallas_src>

<mosaic_0001>
module attributes {stable_mosaic.version = 11 : i64} {
  func.func @_conv_mm_lrelu_kernel(%arg0: i32, %arg1: i32, %arg2: i32, %arg3: memref<128x128xbf16, #tpu.memory_space<vmem>>, %arg4: memref<128x128xbf16, #tpu.memory_space<vmem>>, %arg5: memref<1x128xf32, #tpu.memory_space<vmem>>, %arg6: memref<128x128xf32, #tpu.memory_space<vmem>>, %arg7: memref<128x128xf32, #tpu.memory_space<vmem>>) attributes {dimension_semantics = [#tpu.dimension_semantics<parallel>, #tpu.dimension_semantics<parallel>, #tpu.dimension_semantics<arbitrary>], iteration_bounds = array<i64: 1, 1, 1>, scalar_prefetch = 0 : i64, scratch_operands = 1 : i64, tpu.core_type = #tpu.core_type<tc>, window_params = [{transform_indices = @transform_0, window_bounds = array<i64: 128, 128>}, {transform_indices = @transform_1, window_bounds = array<i64: 128, 128>}, {transform_indices = @transform_2, window_bounds = array<i64: 1, 128>}, {transform_indices = @transform_3, window_bounds = array<i64: 128, 128>}]} {
    %c0_i32 = arith.constant 0 : i32
    %0 = arith.cmpi eq, %arg2, %c0_i32 : i32
    %1 = arith.extui %0 : i1 to i32
    %c0_i32_0 = arith.constant 0 : i32
    %2 = arith.cmpi ne, %1, %c0_i32_0 : i32
    scf.if %2 {
      %cst_10 = arith.constant 0.000000e+00 : f32
      %12 = vector.broadcast %cst_10 : f32 to vector<128x128xf32>
      %c0_11 = arith.constant 0 : index
      %c0_12 = arith.constant 0 : index
      %13 = vector.load %arg7[%c0_11, %c0_12] : memref<128x128xf32, #tpu.memory_space<vmem>>, vector<128x128xf32>
      tpu.vector_store %arg7[%c0_11, %c0_12], %12 {strides = array<i32>} : memref<128x128xf32, #tpu.memory_space<vmem>>, vector<128x128xf32>,
    } else {
    }
    %c0 = arith.constant 0 : index
    %c0_1 = arith.constant 0 : index
    %3 = vector.load %arg7[%c0, %c0_1] : memref<128x128xf32, #tpu.memory_space<vmem>>, vector<128x128xf32>
    %c0_2 = arith.constant 0 : index
    %c0_3 = arith.constant 0 : index
    %4 = vector.load %arg3[%c0_2, %c0_3] : memref<128x128xbf16, #tpu.memory_space<vmem>>, vector<128x128xbf16>
    %c0_4 = arith.constant 0 : index
    %c0_5 = arith.constant 0 : index
    %5 = vector.load %arg4[%c0_4, %c0_5] : memref<128x128xbf16, #tpu.memory_space<vmem>>, vector<128x128xbf16>
    %cst = arith.constant dense<0.000000e+00> : vector<128x128xf32>
    %6 = tpu.matmul %4, %5, %cst {dimension_numbers = #tpu.dot_dimension_numbers<[1], [0], [0], [1], [0, 0, 1, 1], [], []>} : vector<128x128xbf16>, vector<128x128xbf16>, vector<128x128xf32> -> vector<128x128xf32>
    %7 = arith.addf %3, %6 : vector<128x128xf32>
    %c0_6 = arith.constant 0 : index
    %c0_7 = arith.constant 0 : index
    %8 = vector.load %arg7[%c0_6, %c0_7] : memref<128x128xf32, #tpu.memory_space<vmem>>, vector<128x128xf32>
    tpu.vector_store %arg7[%c0_6, %c0_7], %7 {strides = array<i32>} : memref<128x128xf32, #tpu.memory_space<vmem>>, vector<128x128xf32>,
    %c0_i32_8 = arith.constant 0 : i32
    %9 = arith.cmpi eq, %arg2, %c0_i32_8 : i32
    %10 = arith.extui %9 : i1 to i32
    %c0_i32_9 = arith.constant 0 : i32
    %11 = arith.cmpi ne, %10, %c0_i32_9 : i32
    scf.if %11 {
      %c0_10 = arith.constant 0 : index
      %c0_11 = arith.constant 0 : index
      %12 = vector.load %arg7[%c0_10, %c0_11] : memref<128x128xf32, #tpu.memory_space<vmem>>, vector<128x128xf32>
      %c0_12 = arith.constant 0 : index
      %c0_13 = arith.constant 0 : index
      %13 = vector.load %arg5[%c0_12, %c0_13] : memref<1x128xf32, #tpu.memory_space<vmem>>, vector<1x128xf32>
      %14 = vector.broadcast %13 : vector<1x128xf32> to vector<128x128xf32>
      %15 = arith.addf %12, %14 : vector<128x128xf32>
      %cst_14 = arith.constant 0.000000e+00 : f32
      %16 = vector.broadcast %cst_14 : f32 to vector<128x128xf32>
      %17 = arith.cmpf oge, %15, %16 : vector<128x128xf32>
      %cst_15 = arith.constant 0.00999999977 : f32
      %18 = vector.broadcast %cst_15 : f32 to vector<128x128xf32>
      %19 = arith.mulf %18, %15 : vector<128x128xf32>
      %20 = arith.select %17, %15, %19 : vector<128x128xi1>, vector<128x128xf32>
      %c0_16 = arith.constant 0 : index
      %c0_17 = arith.constant 0 : index
      %21 = vector.load %arg6[%c0_16, %c0_17] : memref<128x128xf32, #tpu.memory_space<vmem>>, vector<128x128xf32>
      tpu.vector_store %arg6[%c0_16, %c0_17], %20 {strides = array<i32>} : memref<128x128xf32, #tpu.memory_space<vmem>>, vector<128x128xf32>,
    } else {
    }
    return
  }
  func.func @transform_0(%arg0: i32, %arg1: i32, %arg2: i32) -> (i32, i32) {
    %c0_i32 = arith.constant 0 : i32
    return %arg0, %arg2 : i32, i32
  }
  func.func @transform_1(%arg0: i32, %arg1: i32, %arg2: i32) -> (i32, i32) {
    %c0_i32 = arith.constant 0 : i32
    return %arg2, %arg1 : i32, i32
  }
  func.func @transform_2(%arg0: i32, %arg1: i32, %arg2: i32) -> (i32, i32) {
    %c0_i32 = arith.constant 0 : i32
    %c0_i32_0 = arith.constant 0 : i32
    return %c0_i32, %arg1 : i32, i32
  }
  func.func @transform_3(%arg0: i32, %arg1: i32, %arg2: i32) -> (i32, i32) {
    %c0_i32 = arith.constant 0 : i32
    return %arg0, %arg1 : i32, i32
  }
}

</mosaic_0001>

<bundles_post_ra>
// kernel: tpu_custom_call.1
= control target key start
LH: loop header
LB: loop body
LE: loop exit
PB: predicated region body
PF: predicated region fallthrough
CT: control target
= control target key end

     0   :  { %8 = vsyncpa [#allocation4], 0  ;;  %s721_s0 = inlined_call_operand.hbm [shape: bf16[128,128], index: 0, kind: input, shape index: {}]   ;;  %s722_s1 = inlined_call_operand.hbm [shape: bf16[128,128], index: 1, kind: input, shape index: {}]   ;;  %s723_s2 = inlined_call_operand.vmem [shape: f32[1,128], index: 2, kind: input, shape index: {}]   ;;  %s724_s3 = inlined_call_operand.hbm [shape: f32[128,128], index: 3, kind: output, shape index: {}]  }
   0x1   :  { %9 = vsyncpa [#allocation7], 0 }
   0x2   :  { %10 = vsyncpa [#allocation5], 0  ;;  %s637_s12 = smov [#allocation3]   ;;  %s565_s16 = scalar_lea.hbm %s721_s0, 1024 }
   0x3   :  { %s16_s13 = sshll.u32 %s637_s12, 4  ;;  %p566_p0 = scmp.ne.s32.totalorder %s721_s0, %s565_s16  ;;  %s17_s13 = int_to_ptr.vmem [resolvable:$true] %s16_s13 }
   0x4   :  { %p569_p1 = scmp.lt.u32.totalorder %s565_s16, %s721_s0 }
   0x6   :  { %p571_p2 = pnand %p569_p1, %p566_p0 }
   0x8   :  { %574 = shalt.err (!%p571_p2)
}
   0x9   :  { %s575_s21 = scalar_lea.vmem %s17_s13, 1024  ;;  %p580_p4 = scmp.lt.s32.totalorder %s17_s13, %s17_s13 }
   0xa   :  { %p576_p3 = scmp.ne.s32.totalorder %s17_s13, %s575_s21  ;;  %p581_p5 = scmp.lt.s32.totalorder %s575_s21, %s575_s21 }
   0xc   :  { %p582_p6 = por %p581_p5, %p580_p4 }
   0xe   :  { %p583_p7 = pnand %p582_p6, %p576_p3 }
  0x10   :  { %586 = shalt.err (!%p583_p7)
}
  0x11   :  { %s638_s22 = smov 64   ;;  %s639_s23 = smov 4  }
  0x12   :  { %22 = dma.hbm_to_vmem [thread:$0]  %s721_s0, 1024, %s17_s13, [#allocation4], %s638_s22, %s638_s22, %s639_s23  }
  0x13   :  { %s640_s26 = smov [#allocation6]   ;;  %s587_s30 = scalar_lea.hbm %s722_s1, 1024 }
  0x14   :  { %s28_s27 = sshll.u32 %s640_s26, 4  ;;  %p588_p8 = scmp.ne.s32.totalorder %s722_s1, %s587_s30  ;;  %s29_s27 = int_to_ptr.vmem [resolvable:$true] %s28_s27 }
  0x15   :  { %p591_p9 = scmp.lt.u32.totalorder %s587_s30, %s722_s1 }
  0x17   :  { %p593_p10 = pnand %p591_p9, %p588_p8 }
  0x19   :  { %596 = shalt.err (!%p593_p10)
}
  0x1a   :  { %s597_s8 = scalar_lea.vmem %s29_s27, 1024  ;;  %p602_p12 = scmp.lt.s32.totalorder %s29_s27, %s29_s27 }
  0x1b   :  { %p598_p11 = scmp.ne.s32.totalorder %s29_s27, %s597_s8  ;;  %p603_p13 = scmp.lt.s32.totalorder %s597_s8, %s597_s8 }
  0x1d   :  { %p604_p0 = por %p603_p13, %p602_p12 }
  0x1f   :  { %p605_p1 = pnand %p604_p0, %p598_p11 }
  0x21   :  { %608 = shalt.err (!%p605_p1)
}
  0x22   :  { %34 = dma.hbm_to_vmem [thread:$0]  %s722_s1, 1024, %s29_s27, [#allocation7], %s638_s22, %s638_s22, %s639_s23  }
  0x23   :  { %631 = dma.done.wait [#allocation4], 1024  }
  0x24   :  { %632 = vsyncadd [#allocation4], 4294966272 }
  0x25   :  { %633 = dma.done.wait [#allocation7], 1024  }
  0x26   :  { %634 = vsyncadd [#allocation7], 4294966272  ;;  %v549_v0 = vld [vmem:[#allocation6] sm:$0xff]   ;;  %v550_v1 = vld [vmem:[#allocation6 + $0x8] sm:$0xff]  }
  0x27   :  { %494 = vmatprep.subr.bf16.mxu0 %v549_v0  ;;  %526 = vmatprep.subr.bf16.mxu1 %v549_v0  ;;  %v551_v2 = vld [vmem:[#allocation6 + $0x10] sm:$0xff]   ;;  %v552_v3 = vld [vmem:[#allocation6 + $0x18] sm:$0xff]   ;;  %v557_v4 = vld [vmem:[#allocation3] sm:$0xff]  }
  0x28   :  { %495 = vmatpush3.bf16.msra.mxu0 %v549_v0  ;;  %534 = vmatpush3.bf16.msra.mxu1 %v549_v0  ;;  %v558_v5 = vld [vmem:[#allocation3 + $0x20] sm:$0xff]   ;;  %v554_v7 = vld [vmem:[#allocation6 + $0x28] sm:$0xff]   ;;  %v555_v8 = vld [vmem:[#allocation6 + $0x30] sm:$0xff]  }
  0x29   :  { %496 = vmatprep.subr.bf16.mxu0 %v550_v1  ;;  %527 = vmatprep.subr.bf16.mxu1 %v550_v1  ;;  %v553_v6 = vld [vmem:[#allocation6 + $0x20] sm:$0xff]   ;;  %v556_v9 = vld [vmem:[#allocation6 + $0x38] sm:$0xff]   ;;  %v559_v10 = vld [vmem:[#allocation3 + $0x8] sm:$0xff]  }
  0x2a   :  { %510 = vmatprep.mubr.bf16.mxu0 %v557_v4  ;;  %518 = vmatprep.mubr.bf16.mxu1 %v558_v5  ;;  %v560_v11 = vld [vmem:[#allocation3 + $0x28] sm:$0xff]   ;;  %v561_v12 = vld [vmem:[#allocation3 + $0x10] sm:$0xff]   ;;  %v563_v14 = vld [vmem:[#allocation3 + $0x18] sm:$0xff]  }
  0x2b   :  { %v562_v13 = vld [vmem:[#allocation3 + $0x30] sm:$0xff]   ;;  %v564_v15 = vld [vmem:[#allocation3 + $0x38] sm:$0xff]   ;;  %v691_v16 = vld [vmem:[%s723_s2] ss:$0 sm:$0xff]  ;;  %s641_s2 = smov [#allocation8]  }
  0x2c   :  { %497 = vmatpush3.bf16.msra.mxu0 %v550_v1  ;;  %535 = vmatpush3.bf16.msra.mxu1 %v550_v1  ;;  %s448_s11 = sshll.u32 %s641_s2, 4  ;;  %s449_s11 = int_to_ptr.vmem [resolvable:$true] %s448_s11 }
  0x2d   :  { %498 = vmatprep.subr.bf16.mxu0 %v551_v2  ;;  %528 = vmatprep.subr.bf16.mxu1 %v551_v2  ;;  %s609_s12 = scalar_lea.vmem %s449_s11, 2048  ;;  %p614_p3 = scmp.lt.s32.totalorder %s449_s11, %s449_s11 }
  0x2e   :  { %p610_p2 = scmp.ne.s32.totalorder %s449_s11, %s609_s12  ;;  %p615_p4 = scmp.lt.s32.totalorder %s609_s12, %s609_s12 }
  0x30   :  { %499 = vmatpush3.bf16.msra.mxu0 %v551_v2  ;;  %536 = vmatpush3.bf16.msra.mxu1 %v551_v2  ;;  %p616_p5 = por %p615_p4, %p614_p3 }
  0x31   :  { %500 = vmatprep.subr.bf16.mxu0 %v552_v3  ;;  %529 = vmatprep.subr.bf16.mxu1 %v552_v3 }
  0x32   :  { %p617_p6 = pnand %p616_p5, %p610_p2 }
  0x34   :  { %501 = vmatpush3.bf16.msra.mxu0 %v552_v3  ;;  %537 = vmatpush3.bf16.msra.mxu1 %v552_v3 }
  0x35   :  { %502 = vmatprep.subr.bf16.mxu0 %v553_v6  ;;  %530 = vmatprep.subr.bf16.mxu1 %v553_v6 }
  0x38   :  { %503 = vmatpush3.bf16.msra.mxu0 %v553_v6  ;;  %538 = vmatpush3.bf16.msra.mxu1 %v553_v6 }
  0x39   :  { %504 = vmatprep.subr.bf16.mxu0 %v554_v7  ;;  %531 = vmatprep.subr.bf16.mxu1 %v554_v7 }
  0x3c   :  { %505 = vmatpush3.bf16.msra.mxu0 %v554_v7  ;;  %539 = vmatpush3.bf16.msra.mxu1 %v554_v7 }
  0x3d   :  { %506 = vmatprep.subr.bf16.mxu0 %v555_v8  ;;  %532 = vmatprep.subr.bf16.mxu1 %v555_v8 }
  0x40   :  { %507 = vmatpush3.bf16.msra.mxu0 %v555_v8  ;;  %540 = vmatpush3.bf16.msra.mxu1 %v555_v8 }
  0x41   :  { %508 = vmatprep.subr.bf16.mxu0 %v556_v9  ;;  %533 = vmatprep.subr.bf16.mxu1 %v556_v9 }
  0x44   :  { %509 = vmatpush3.bf16.msra.mxu0 %v556_v9  ;;  %541 = vmatpush3.bf16.msra.mxu1 %v556_v9 }
  0x47   :  { %511 = vmatmul.mubr.bf16.vlgmr.msra.gmra.mrb[0].mxu0 %v559_v10  ;;  %519 = vmatmul.mubr.bf16.vlgmr.msra.gmra.mrb[0].mxu1 %v560_v11 }
  0x48   :  { %514 = vmatprep.mubr.bf16.mxu0 %v561_v12  ;;  %522 = vmatprep.mubr.bf16.mxu1 %v562_v13 }
  0x4f   :  { %515 = vmatmul.mubr.bf16.gmra.mrb[4].mxu0 %v563_v14  ;;  %523 = vmatmul.mubr.bf16.gmra.mrb[4].mxu1 %v564_v15 }
 0x11a   :  { %v512_v17 = vpop.f32.mrb[0].mxu0  ;;  %v520_v18 = vpop.f32.mrb[0].mxu1 }
 0x11b   :  { %v365_v19 = vadd.f32 %v512_v17, %v691_v16  ;;  %v373_v20 = vadd.f32 %v520_v18, %v691_v16  ;;  %v242_v21 = vpop.f32.mrb[1].mxu0  ;;  %v274_v22 = vpop.f32.mrb[1].mxu1 }
 0x11c   :  { %v363_v23 = vadd.f32 %v691_v16, %v242_v21  ;;  %v371_v24 = vadd.f32 %v691_v16, %v274_v22  ;;  %v513_v25 = vpop.f32.mrb[2].mxu0  ;;  %v521_v26 = vpop.f32.mrb[2].mxu1 }
 0x11d   :  { %vm381_vm0 = vcmp.ge.f32.partialorder %v365_v19, 0.0  ;;  %v397_v27 = vmul.f32 0.01, %v365_v19  ;;  %vm389_vm1 = vcmp.ge.f32.partialorder %v373_v20, 0.0  ;;  %v405_v28 = vmul.f32 0.01, %v373_v20 }
 0x11e   :  { %vm379_vm2 = vcmp.ge.f32.partialorder %v363_v23, 0.0  ;;  %v395_v29 = vmul.f32 0.01, %v363_v23  ;;  %vm387_vm3 = vcmp.ge.f32.partialorder %v371_v24, 0.0  ;;  %v403_v30 = vmul.f32 0.01, %v371_v24 }
 0x11f   :  { %v413_v31 = vsel %vm381_vm0, %v365_v19, %v397_v27  ;;  %v421_v32 = vsel %vm389_vm1, %v373_v20, %v405_v28  ;;  %v366_v33 = vadd.f32 %v513_v25, %v691_v16  ;;  %v374_v34 = vadd.f32 %v521_v26, %v691_v16  ;;  %v245_v35 = vpop.f32.mrb[3].mxu0  ;;  %v277_v36 = vpop.f32.mrb[3].mxu1 }
 0x120   :  { %429 = vst [vmem:[#allocation8 + $0x10] sm:$0xff] %v413_v31  ;;  %437 = vst [vmem:[#allocation8 + $0x50] sm:$0xff] %v421_v32  ;;  %v411_v37 = vsel %vm379_vm2, %v363_v23, %v395_v29  ;;  %v419_v38 = vsel %vm387_vm3, %v371_v24, %v403_v30  ;;  %v364_v39 = vadd.f32 %v691_v16, %v245_v35 }
 0x121   :  { %v372_v40 = vadd.f32 %v691_v16, %v277_v36  ;;  %427 = vst [vmem:[#allocation8] sm:$0xff] %v411_v37  ;;  %435 = vst [vmem:[#allocation8 + $0x40] sm:$0xff] %v419_v38  ;;  %vm382_vm4 = vcmp.ge.f32.partialorder %v366_v33, 0.0  ;;  %v398_v41 = vmul.f32 0.01, %v366_v33  ;;  %vm390_vm5 = vcmp.ge.f32.partialorder %v374_v34, 0.0 }
 0x122   :  { %v406_v42 = vmul.f32 0.01, %v374_v34  ;;  %vm380_vm6 = vcmp.ge.f32.partialorder %v364_v39, 0.0  ;;  %v396_v43 = vmul.f32 0.01, %v364_v39  ;;  %v516_v47 = vpop.f32.mrb[4].mxu0 }
 0x123   :  { %vm388_vm7 = vcmp.ge.f32.partialorder %v372_v40, 0.0  ;;  %v404_v44 = vmul.f32 0.01, %v372_v40  ;;  %v414_v45 = vsel %vm382_vm4, %v366_v33, %v398_v41  ;;  %v524_v48 = vpop.f32.mrb[4].mxu1  ;;  %v369_v51 = vadd.f32 %v516_v47, %v691_v16  ;;  %v258_v53 = vpop.f32.mrb[5].mxu0 }
 0x124   :  { %v422_v46 = vsel %vm390_vm5, %v374_v34, %v406_v42  ;;  %430 = vst [vmem:[#allocation8 + $0x18] sm:$0xff] %v414_v45  ;;  %v412_v49 = vsel %vm380_vm6, %v364_v39, %v396_v43  ;;  %v377_v52 = vadd.f32 %v524_v48, %v691_v16  ;;  %v290_v54 = vpop.f32.mrb[5].mxu1  ;;  %v367_v55 = vadd.f32 %v691_v16, %v258_v53  ;;  %v517_v57 = vpop.f32.mrb[6].mxu0 }
 0x125   :  { %438 = vst [vmem:[#allocation8 + $0x58] sm:$0xff] %v422_v46  ;;  %v420_v50 = vsel %vm388_vm7, %v372_v40, %v404_v44  ;;  %428 = vst [vmem:[#allocation8 + $0x8] sm:$0xff] %v412_v49  ;;  %v375_v56 = vadd.f32 %v691_v16, %v290_v54  ;;  %v525_v58 = vpop.f32.mrb[6].mxu1  ;;  %vm385_vm8 = vcmp.ge.f32.partialorder %v369_v51, 0.0  ;;  %v401_v59 = vmul.f32 0.01, %v369_v51 }
 0x126   :  { %436 = vst [vmem:[#allocation8 + $0x48] sm:$0xff] %v420_v50  ;;  %vm393_vm9 = vcmp.ge.f32.partialorder %v377_v52, 0.0  ;;  %v409_v60 = vmul.f32 0.01, %v377_v52  ;;  %vm383_vm10 = vcmp.ge.f32.partialorder %v367_v55, 0.0  ;;  %v370_v1 = vadd.f32 %v517_v57, %v691_v16  ;;  %v261_v3 = vpop.f32.mrb[7].mxu0 }
 0x127   :  { %v399_v61 = vmul.f32 0.01, %v367_v55  ;;  %vm391_vm11 = vcmp.ge.f32.partialorder %v375_v56, 0.0  ;;  %v407_v62 = vmul.f32 0.01, %v375_v56  ;;  %v417_v63 = vsel %vm385_vm8, %v369_v51, %v401_v59  ;;  %v293_v4 = vpop.f32.mrb[7].mxu1 }
 0x128   :  { %v425_v0 = vsel %vm393_vm9, %v377_v52, %v409_v60  ;;  %v378_v2 = vadd.f32 %v525_v58, %v691_v16  ;;  %433 = vst [vmem:[#allocation8 + $0x30] sm:$0xff] %v417_v63  ;;  %v368_v7 = vadd.f32 %v691_v16, %v261_v3  ;;  %v376_v8 = vadd.f32 %v691_v16, %v293_v4 }
 0x129   :  { %441 = vst [vmem:[#allocation8 + $0x70] sm:$0xff] %v425_v0  ;;  %v415_v5 = vsel %vm383_vm10, %v367_v55, %v399_v61  ;;  %v423_v6 = vsel %vm391_vm11, %v375_v56, %v407_v62  ;;  %vm386_vm12 = vcmp.ge.f32.partialorder %v370_v1, 0.0  ;;  %v402_v9 = vmul.f32 0.01, %v370_v1 }
 0x12a   :  { %431 = vst [vmem:[#allocation8 + $0x20] sm:$0xff] %v415_v5  ;;  %439 = vst [vmem:[#allocation8 + $0x60] sm:$0xff] %v423_v6  ;;  %vm394_vm13 = vcmp.ge.f32.partialorder %v378_v2, 0.0  ;;  %v410_v10 = vmul.f32 0.01, %v378_v2  ;;  %vm384_vm14 = vcmp.ge.f32.partialorder %v368_v7, 0.0 }
 0x12b   :  { %v400_v11 = vmul.f32 0.01, %v368_v7  ;;  %vm392_vm15 = vcmp.ge.f32.partialorder %v376_v8, 0.0  ;;  %v408_v12 = vmul.f32 0.01, %v376_v8  ;;  %v418_v13 = vsel %vm386_vm12, %v370_v1, %v402_v9 }
 0x12c   :  { %v426_v14 = vsel %vm394_vm13, %v378_v2, %v410_v10  ;;  %434 = vst [vmem:[#allocation8 + $0x38] sm:$0xff] %v418_v13 }
 0x12d   :  { %442 = vst [vmem:[#allocation8 + $0x78] sm:$0xff] %v426_v14  ;;  %v416_v15 = vsel %vm384_vm14, %v368_v7, %v400_v11  ;;  %v424_v17 = vsel %vm392_vm15, %v376_v8, %v408_v12 }
 0x12e   :  { %432 = vst [vmem:[#allocation8 + $0x28] sm:$0xff] %v416_v15  ;;  %440 = vst [vmem:[#allocation8 + $0x68] sm:$0xff] %v424_v17 }
 0x12f   :  { %620 = shalt.err (!%p617_p6)
}
 0x130   :  { %s621_s15 = scalar_lea.hbm %s724_s3, 2048 }
 0x131   :  { %p622_p7 = scmp.ne.s32.totalorder %s724_s3, %s621_s15  ;;  %p625_p8 = scmp.lt.u32.totalorder %s621_s15, %s724_s3 }
 0x133   :  { %p627_p9 = pnand %p625_p8, %p622_p7 }
 0x135   :  { %630 = shalt.err (!%p627_p9)
}
 0x136   :  { %s642_s20 = smov 128   ;;  %s643_s21 = smov 8  }
 0x137   :  { %454 = dma.vmem_to_hbm [thread:$0]  %s449_s11, 2048, %s724_s3, [#allocation5], %s642_s20, %s642_s20, %s643_s21  }
 0x138   :  { %635 = dma.done.wait [#allocation5], 2048  }
 0x139   :  { %636 = vsyncadd [#allocation5], 4294965248 }
 0x13a   :  { %458 = vsyncpa [#allocation4], 1 }
 0x13b   :  { %459 = vsyncpa [#allocation7], 1 }
 0x13c   :  { %460 = vsyncpa [#allocation5], 1 }

</bundles_post_ra>
